<compile_context>
chip_gen: v7x
topology: tpu7x:2x2x1
jax: 0.10.0
libtpu: 0.0.40
codegen_flags: <defaults>
</compile_context>

<pallas_src>
import functools

import numpy as np
import jax
import jax.numpy as jnp
from jax.experimental import pallas as pl
from jax.experimental.pallas import tpu as pltpu


_LANE = 128
_SMALL_BYTES = 256 * 1024  # below this a pallas_call launch is pure overhead


# ----------------------------------------------------------------------------
# Kernels
# ----------------------------------------------------------------------------
def _copy_cast_kernel(x_ref, o_ref):
    # Elementwise identity copy; o_ref's dtype encodes any cast (e.g. i32->f32).
    o_ref[...] = x_ref[...].astype(o_ref.dtype)


def _dma_copy_kernel(x_hbm, o_hbm):
    # Same-dtype copy: one HBM->HBM DMA, no grid, no VMEM staging, no VPU pass.
    def body(sem):
        cp = pltpu.make_async_copy(x_hbm, o_hbm, sem)
        cp.start()
        cp.wait()

    pl.run_scoped(body, pltpu.SemaphoreType.DMA)


# ----------------------------------------------------------------------------
# Generation-aware tuning
# ----------------------------------------------------------------------------
@functools.lru_cache(maxsize=1)
def _chip_params():
    """Returns (block_budget_bytes, vmem_limit_bytes, n_tensorcores).

    block_budget counts one input block + one output block per grid step
    (double-buffering doubles the resident footprint, which stays well under
    vmem_limit_bytes on every generation).
    """
    vmem = None
    try:
        vmem = int(pltpu.get_tpu_info().vmem_capacity_bytes)
    except Exception:
        vmem = None
    kind = ""
    try:
        kind = jax.devices()[0].device_kind.lower()
    except Exception:
        kind = ""
    if vmem is None:
        vmem = 64 * 2**20  # assume the tightest (v7x-like) budget when unknown

    if "v7" in kind or vmem <= 64 * 2**20:
        # v7x: 64 MiB physical VMEM, 3.2 TB/s HBM, 2 TensorCores per chip.
        return 14 * 2**20, 48 * 2**20, 2
    # v5e / v6e: 128 MiB physical VMEM, single TensorCore.
    return 16 * 2**20, 64 * 2**20, 1


def _round_up(x, m):
    return -(-x // m) * m


def _sublane_align(in_dtype, out_dtype):
    """Sublane alignment = lcm of input/output packing (powers of two -> max)."""
    def pack(dt):
        return 8 * max(1, 4 // np.dtype(dt).itemsize)

    return max(pack(in_dtype), pack(out_dtype))


def _choose_block_rows(rows, bytes_per_row, align, budget_bytes, num_tc):
    """Largest aligned row block fitting the per-step budget.

    On 1-TC chips (v5e/v6e): one block when it fits (no forced split).
    On 2-TC chips (v7x): an even number of near-equal steps so megacore
    sharding keeps both cores busy until the end.
    """
    if rows <= align:
        return rows  # full extent along that axis is always a legal block dim
    budget_rows = max(align, (budget_bytes // max(bytes_per_row, 1)) // align * align)
    if num_tc <= 1:
        return min(_round_up(rows, align), budget_rows)
    n_steps = max(2, -(-rows // budget_rows))
    if n_steps % 2:
        n_steps += 1
    return max(align, min(budget_rows, _round_up(-(-rows // n_steps), align)))


# ----------------------------------------------------------------------------
# pallas_call wrappers
# ----------------------------------------------------------------------------
def _pallas_copy_cast(x2d, out_dtype):
    rows, cols = x2d.shape
    in_sz = x2d.dtype.itemsize
    out_sz = np.dtype(out_dtype).itemsize

    block_budget, vmem_limit, num_tc = _chip_params()
    align = _sublane_align(x2d.dtype, out_dtype)
    block_rows = _choose_block_rows(
        rows, cols * (in_sz + out_sz), align, block_budget, num_tc
    )
    grid = (pl.cdiv(rows, block_rows),)

    cost = pl.CostEstimate(
        flops=0,
        transcendentals=0,
        bytes_accessed=rows * cols * (in_sz + out_sz),
    )

    return pl.pallas_call(
        _copy_cast_kernel,
        out_shape=jax.ShapeDtypeStruct((rows, cols), out_dtype),
        grid_spec=pltpu.PrefetchScalarGridSpec(
            num_scalar_prefetch=0,
            grid=grid,
            in_specs=[pl.BlockSpec((block_rows, cols), lambda i: (i, 0))],
            out_specs=pl.BlockSpec((block_rows, cols), lambda i: (i, 0)),
        ),
        compiler_params=pltpu.CompilerParams(
            dimension_semantics=("parallel",),
            vmem_limit_bytes=vmem_limit,
        ),
        cost_estimate=cost,
    )(x2d)


def _pallas_dma_copy(x):
    nbytes = int(x.size) * x.dtype.itemsize
    return pl.pallas_call(
        _dma_copy_kernel,
        out_shape=jax.ShapeDtypeStruct(x.shape, x.dtype),
        in_specs=[pl.BlockSpec(memory_space=pl.ANY)],
        out_specs=pl.BlockSpec(memory_space=pl.ANY),
        cost_estimate=pl.CostEstimate(
            flops=0, transcendentals=0, bytes_accessed=2 * nbytes
        ),
    )(x)


# ----------------------------------------------------------------------------
# ToTensor.forward equivalent
# ----------------------------------------------------------------------------
def to_tensor(x, *, force_kernel=False):
    """JAX/Pallas equivalent of ToTensor.forward.

    - jax.Array input -> returned unchanged (PyTorch returns the same tensor).
    - anything else   -> converted to a float32 array (torch.Tensor(x)).
    `force_kernel=True` routes eligible inputs through the Pallas kernels
    (same-dtype -> grid-free HBM->HBM DMA copy; dtype cast -> tiled kernel).
    """
    already_array = isinstance(x, jax.Array)
    if already_array and not force_kernel:
        # Exact PyTorch semantics: same tensor, no copy, no HBM traffic.
        return x

    x_arr = jnp.asarray(x)
    out_dtype = np.dtype(x_arr.dtype) if already_array else np.dtype(jnp.float32)

    total = int(x_arr.size)
    if x_arr.ndim == 0 or total == 0:
        return x_arr.astype(out_dtype)

    if x_arr.dtype == out_dtype:
        if not force_kernel:
            return x_arr  # fresh device array already; no extra pass needed
        # Pure copy: one HBM->HBM DMA, any shape (no lane-multiple requirement).
        return _pallas_dma_copy(x_arr)

    nbytes = total * (x_arr.dtype.itemsize + out_dtype.itemsize)
    if not force_kernel and nbytes < _SMALL_BYTES:
        # Kernel launch overhead dwarfs the copy for tiny inputs.
        return x_arr.astype(out_dtype)

    if total % _LANE != 0:
        # TODO(synk): ragged (non multiple-of-128) element counts with a dtype
        # cast fall back to a plain XLA cast; padding them through the kernel
        # would cost an extra full-array pass for zero benefit on a pure copy.
        return x_arr.astype(out_dtype)

    rows, cols = total // _LANE, _LANE
    out2d = _pallas_copy_cast(x_arr.reshape(rows, cols), out_dtype)
    return out2d.reshape(x_arr.shape)


if __name__ == "__main__":
    key = jax.random.PRNGKey(0)
    # NCHW input, as the PyTorch forward would receive.
    x = jax.random.normal(key, (2, 4, 16, 16), dtype=jnp.float32)

    # 1) Already an array -> identity, no kernel (matches PyTorch semantics).
    y = to_tensor(x)
    jax.block_until_ready(y)
    assert y.shape == x.shape and y.dtype == x.dtype
    assert bool(jnp.all(y == x))

    # 2) Force the grid-free HBM->HBM DMA copy on the same input.
    y_k = to_tensor(x, force_kernel=True)
    jax.block_until_ready(y_k)
    assert y_k.shape == x.shape and y_k.dtype == x.dtype
    assert bool(jnp.all(y_k == x))

    # 3) DMA copy path also handles arbitrary (non multiple-of-128) shapes.
    x_odd = jax.random.normal(key, (3, 5, 7), dtype=jnp.float32)
    y_odd = to_tensor(x_odd, force_kernel=True)
    jax.block_until_ready(y_odd)
    assert y_odd.shape == x_odd.shape and y_odd.dtype == x_odd.dtype
    assert bool(jnp.all(y_odd == x_odd))

    # 4) Non-tensor input (nested python list) -> float32 tensor, same values.
    x_list = [[1, 2, 3, 4], [5, 6, 7, 8]]
    y_l = to_tensor(x_list)
    jax.block_until_ready(y_l)
    assert y_l.dtype == jnp.float32 and y_l.shape == (2, 4)
    assert bool(jnp.all(y_l == jnp.asarray(x_list, dtype=jnp.float32)))

    # 5) Non-tensor int32 numpy batch forced through the tiled casting kernel
    #    (torch.Tensor(int array) -> float32).
    x_np = np.arange(2 * 4 * 16 * 16, dtype=np.int32).reshape(2, 4, 16, 16)
    y_c = to_tensor(x_np, force_kernel=True)
    jax.block_until_ready(y_c)
    assert y_c.dtype == jnp.float32 and y_c.shape == (2, 4, 16, 16)
    assert bool(jnp.all(y_c == jnp.asarray(x_np, dtype=jnp.float32)))

    print("KERNEL_OK")
</pallas_src>

<mosaic_0001>
module attributes {stable_mosaic.version = 11 : i64} {
  func.func @_dma_copy_kernel(%arg0: memref<2x4x16x16xf32, #tpu.memory_space<any>>, %arg1: memref<2x4x16x16xf32, #tpu.memory_space<any>>) attributes {dimension_semantics = [], scalar_prefetch = 0 : i64, scratch_operands = 0 : i64, tpu.core_type = #tpu.core_type<tc>} {
    "tpu.region"() ({
      %0 = tpu.sem_alloc : memref<!tpu.dma_semaphore, #tpu.memory_space<semaphore_mem>>
      tpu.enqueue_dma source(%arg0 : memref<2x4x16x16xf32, #tpu.memory_space<any>>) target(%arg1 : memref<2x4x16x16xf32, #tpu.memory_space<any>>) target_semaphore(%0 : memref<!tpu.dma_semaphore, #tpu.memory_space<semaphore_mem>>)
      tpu.wait_dma2 semaphore(%0 : memref<!tpu.dma_semaphore, #tpu.memory_space<semaphore_mem>>) src(%arg0 : memref<2x4x16x16xf32, #tpu.memory_space<any>>) dst(%arg1 : memref<2x4x16x16xf32, #tpu.memory_space<any>>)
      tpu.yield
    }) : () -> ()
    return
  }
}

</mosaic_0001>

<bundles_post_ra>
// kernel: tpu_custom_call.1
= control target key start
LH: loop header
LB: loop body
LE: loop exit
PB: predicated region body
PF: predicated region fallthrough
CT: control target
= control target key end

     0   :  { %s29_s6 = smov [#allocation2]   ;;  %s30_s7 = smov [#allocation3]   ;;  %s48_s0 = inlined_call_operand.hbm [shape: f32[2,4,16,16], index: 0, kind: input, shape index: {}]   ;;  %s49_s1 = inlined_call_operand.hbm [shape: f32[2,4,16,16], index: 1, kind: output, shape index: {}]  }
   0x1   :  { %s31_s8 = smov 0  }
   0x2   :  { %18 = dma.general %s48_s0, 2048, %s49_s1, %s29_s6, %s30_s7, [#allocation4], %s31_s8, 0  }
   0x3   :  { %27 = dma.done.wait [#allocation2], 2048 }
   0x4   :  { %28 = vsyncadd [#allocation2], 4294965248 }

</bundles_post_ra>
